<compile_context>
chip_gen: v7x
topology: tpu7x:2x2x1
jax: 0.10.0
libtpu: 0.0.40
codegen_flags: <defaults>
</compile_context>

<pallas_src>
import functools

import jax
import jax.numpy as jnp
from jax import lax
from jax.experimental import pallas as pl
from jax.experimental.pallas import tpu as pltpu

EPS = 1e-5  # nn.InstanceNorm2d default eps

_SELU_ALPHA = 1.6732632423543772
_SELU_SCALE = 1.0507009873554805


def _apply_act(name, x):
    if name == "None":
        return x
    if name == "ReLU":
        return jnp.maximum(x, 0.0)
    if name == "ReLU6":
        return jnp.clip(x, 0.0, 6.0)
    if name == "Sigmoid":
        return jax.nn.sigmoid(x)
    if name == "Hardtanh":
        # the module constructs nn.Hardtanh(min_val=0.0, max_val=1.0)
        return jnp.clip(x, 0.0, 1.0)
    if name == "ELU":
        return jnp.where(x > 0, x, jnp.exp(jnp.minimum(x, 0.0)) - 1.0)
    if name == "CELU":
        return jnp.where(x > 0, x, jnp.exp(jnp.minimum(x, 0.0)) - 1.0)
    if name == "SELU":
        return _SELU_SCALE * jnp.where(
            x > 0, x, _SELU_ALPHA * (jnp.exp(jnp.minimum(x, 0.0)) - 1.0))
    # TODO(synk): RReLU / PReLU (random / learned slope) not wired up; module default is 'None'.
    raise NotImplementedError(name)


def _round_up(a, b):
    return (a + b - 1) // b * b


def _fused_block_kernel(*refs, H, W, act1, act2, use_skip, m2_shortcut):
    if use_skip:
        (x_ref, skip_ref, pos_ref, w1_ref, g1_ref, be1_ref,
         w2_ref, g2_ref, be2_ref, m2h_ref, o_ref, acc_ref) = refs
    else:
        (x_ref, pos_ref, w1_ref, g1_ref, be1_ref,
         w2_ref, g2_ref, be2_ref, m2h_ref, o_ref, acc_ref) = refs
        skip_ref = None

    k = pl.program_id(1)

    @pl.when(k == 0)
    def _():
        acc_ref[...] = jnp.zeros_like(acc_ref)

    HW = H * W
    inv_hw = 1.0 / HW

    x = x_ref[0].astype(jnp.float32)            # (Cb, HW), lane-dense

    h_idx = pos_ref[0:1, :]                     # (1, HW) row index of each flat position
    w_idx = pos_ref[1:2, :]                     # (1, HW) col index of each flat position
    first_col = w_idx == 0
    last_col = w_idx == W - 1
    first_row = h_idx == 0
    last_row = h_idx == H - 1

    # ---- reflection-padded column neighbours (2 rolls + 2 selects) ----
    left = pltpu.roll(x, shift=1, axis=1)       # value at (h, w-1), wraps at w == 0
    right = pltpu.roll(x, shift=HW - 1, axis=1)  # value at (h, w+1), wraps at w == W-1
    col_m1 = jnp.where(first_col, right, left)  # reflect (h, -1) -> (h, 1)
    col_p1 = jnp.where(last_col, left, right)   # reflect (h, W)  -> (h, W-2)
    cols = (col_m1, x, col_p1)

    # ---- depthwise 3x3: factor tap weights before the row shifts ----
    w1 = w1_ref[...]                            # (Cb, 9), hoisted single load
    c = []
    for ki in range(3):
        s = cols[0] * w1[:, 3 * ki:3 * ki + 1]
        s = s + cols[1] * w1[:, 3 * ki + 1:3 * ki + 2]
        s = s + cols[2] * w1[:, 3 * ki + 2:3 * ki + 3]
        c.append(s)                             # c[ki](h,w) = sum_kj W[ki,kj]*x(h, w+kj-1)

    # row shifts with reflection (4 rolls + 2 selects)
    c0_up = pltpu.roll(c[0], shift=W, axis=1)        # c0 at (h-1, w), wraps at h == 0
    c0_dn = pltpu.roll(c[0], shift=HW - W, axis=1)   # c0 at (h+1, w)
    c2_up = pltpu.roll(c[2], shift=W, axis=1)        # c2 at (h-1, w)
    c2_dn = pltpu.roll(c[2], shift=HW - W, axis=1)   # c2 at (h+1, w), wraps at h == H-1
    acc = (jnp.where(first_row, c0_dn, c0_up)        # reflect (-1, w) -> (1, w)
           + c[1]
           + jnp.where(last_row, c2_up, c2_dn))      # reflect (H, w) -> (H-2, w)

    # ---- InstanceNorm1 (two-pass variance) + act1; conv1 bias cancels with the mean ----
    m1 = jnp.sum(acc, axis=1, keepdims=True) * inv_hw
    d1 = acc - m1
    v1 = jnp.sum(d1 * d1, axis=1, keepdims=True) * inv_hw
    y = d1 * lax.rsqrt(v1 + EPS)
    y = y * g1_ref[...] + be1_ref[...]
    y = _apply_act(act1, y)

    # ---- partial 1x1 conv on the MXU, accumulated over Cin blocks ----
    acc_ref[...] += jnp.dot(w2_ref[0], y, preferred_element_type=jnp.float32)

    # ---- finalize: InstanceNorm2 + act2 + skip; conv2 bias cancels with the mean ----
    @pl.when(k == pl.num_programs(1) - 1)
    def _():
        z = acc_ref[...]
        if m2_shortcut:
            m2 = m2h_ref[...]                   # act1=='None': mean(z) == w2 @ be1 exactly
        else:
            m2 = jnp.sum(z, axis=1, keepdims=True) * inv_hw
        d2 = z - m2
        v2 = jnp.sum(d2 * d2, axis=1, keepdims=True) * inv_hw
        out = d2 * lax.rsqrt(v2 + EPS)
        out = out * g2_ref[...] + be2_ref[...]
        out = _apply_act(act2, out)
        if use_skip:
            out = out + skip_ref[0].astype(jnp.float32)
        o_ref[0] = out.astype(o_ref.dtype)


def mobile_v1_block(x, params, *, kernel_size=3, stride=1, use_skip_connection=True,
                    activation_fn1="None", activation_fn2="None", cin_block=None):
    if kernel_size != 3 or stride != 1:
        # TODO(synk): general odd K needs more roll/select terms; stride>1 breaks the skip shape.
        raise NotImplementedError("fused Pallas path supports kernel_size=3, stride=1")

    N, Cin, H, W = x.shape
    HW = H * W
    K = kernel_size
    # Lane-dense layout / unmasked stores require HW % 128 == 0.
    # TODO(synk): pad flat HW and mask padded lanes out of the IN statistics otherwise.
    assert HW % 128 == 0, f"H*W={HW} must be a multiple of 128 for the lane-dense layout"

    w2 = params["w2"].astype(jnp.float32)                        # (Cout, Cin)
    Cout = w2.shape[0]
    if use_skip_connection and Cout != Cin:
        raise ValueError("skip connection requires out_channels == in_channels")

    Cout_p = _round_up(Cout, 8)

    # ---- Cin block size: keep per-step VMEM bounded (accumulator + skip + db'd blocks) ----
    if cin_block is None:
        budget = 40 * 2 ** 20        # conservative: fits under v7x's 64 MiB physical VMEM
        fixed = (3 + (1 if use_skip_connection else 0)) * Cout_p * HW * 4
        per_ch = (2 * HW + 2 * Cout_p) * 4 + 6 * HW * 4   # db'd x + w2 column + live temporaries
        cin_block = max(8, min((budget - fixed) // per_ch, 512, _round_up(Cin, 8)))
    Cb = max(8, (int(cin_block) // 8) * 8)
    Cin_p = _round_up(Cin, Cb)
    nkb = Cin_p // Cb

    # ---- parameter prep (channel padding to multiples of 8) ----
    w1 = params["w1"].reshape(Cin, K * K).astype(jnp.float32)    # depthwise taps, (Cin, 9)
    g1 = params["g1"].reshape(Cin, 1).astype(jnp.float32)
    be1 = params["be1"].reshape(Cin, 1).astype(jnp.float32)
    g2 = params["g2"].reshape(Cout, 1).astype(jnp.float32)
    be2 = params["be2"].reshape(Cout, 1).astype(jnp.float32)
    # NOTE: params["b1"] / params["b2"] are intentionally NOT used — a per-channel bias added
    # immediately before InstanceNorm is removed by the mean subtraction.  Only valid because
    # norm1/norm2 directly follow conv1/conv2 in this module.

    def pad0(a, rows, cols=None):
        pr = rows - a.shape[0]
        pc = 0 if cols is None else cols - a.shape[1]
        return jnp.pad(a, ((0, pr), (0, pc)))

    w1_p = pad0(w1, Cin_p)
    g1_p = pad0(g1, Cin_p)
    be1_p = pad0(be1, Cin_p)
    w2_p = pad0(w2, Cout_p, Cin_p)
    g2_p = pad0(g2, Cout_p)
    be2_p = pad0(be2, Cout_p)
    m2_hint = jnp.dot(w2_p, be1_p)                               # (Cout_p, 1): mean(z) if act1=='None'
    w2_blk = w2_p.reshape(Cout_p, nkb, Cb).transpose(1, 0, 2)    # (nkb, Cout_p, Cb)

    # (h, w) index of every flat position — tiny constant table, avoids vector int div/mod.
    h_idx = jnp.repeat(jnp.arange(H, dtype=jnp.int32), W).reshape(1, HW)
    w_idx = jnp.tile(jnp.arange(W, dtype=jnp.int32), H).reshape(1, HW)
    pos = jnp.concatenate([h_idx, w_idx], axis=0)                # (2, HW) int32

    x_flat = x.reshape(N, Cin, HW).astype(jnp.float32)           # contiguous view of NCHW
    if Cin_p != Cin:
        x_flat = jnp.pad(x_flat, ((0, 0), (0, Cin_p - Cin), (0, 0)))

    # ---- BlockSpecs ----
    in_specs = [pl.BlockSpec((1, Cb, HW), lambda n, k: (n, k, 0))]      # x (per Cin block)
    inputs = [x_flat]
    if use_skip_connection:
        # skip term: full-channel block, same index over k -> resident, DMA'd once per sample
        in_specs.append(pl.BlockSpec((1, Cout_p, HW), lambda n, k: (n, 0, 0)))
        inputs.append(x_flat)
    in_specs += [
        pl.BlockSpec((2, HW), lambda n, k: (0, 0)),                     # (h, w) index table
        pl.BlockSpec((Cb, K * K), lambda n, k: (k, 0)),                 # depthwise taps block
        pl.BlockSpec((Cb, 1), lambda n, k: (k, 0)),                     # IN1 gamma block
        pl.BlockSpec((Cb, 1), lambda n, k: (k, 0)),                     # IN1 beta block
        pl.BlockSpec((1, Cout_p, Cb), lambda n, k: (k, 0, 0)),          # 1x1 weight (Cin block)
        pl.BlockSpec((Cout_p, 1), lambda n, k: (0, 0)),                 # IN2 gamma
        pl.BlockSpec((Cout_p, 1), lambda n, k: (0, 0)),                 # IN2 beta
        pl.BlockSpec((Cout_p, 1), lambda n, k: (0, 0)),                 # m2 hint (w2 @ be1)
    ]
    inputs += [pos, w1_p, g1_p, be1_p, w2_blk, g2_p, be2_p, m2_hint]

    # ---- cost estimate + VMEM limit ----
    flops = N * HW * (2 * Cout_p * Cin_p + 18 * Cin_p + 12 * (Cin_p + Cout_p))
    bytes_accessed = 4 * (N * Cin_p * HW * (2 if use_skip_connection else 1)
                          + N * Cout_p * HW + Cout_p * Cin_p
                          + 12 * Cin_p + 3 * Cout_p + 2 * HW)
    transcendentals = N * (Cin_p + Cout_p)
    if activation_fn1 in ("ELU", "CELU", "SELU", "Sigmoid"):
        transcendentals += N * Cin_p * HW
    if activation_fn2 in ("ELU", "CELU", "SELU", "Sigmoid"):
        transcendentals += N * Cout_p * HW

    vmem_est = 4 * (2 * Cb + 3 * Cout_p + (Cout_p if use_skip_connection else 0) + 10 * Cb) * HW \
        + 4 * 2 * (Cb * K * K + 2 * Cb + Cout_p * Cb + 3 * Cout_p + 2 * HW)
    vmem_limit = int(min(max(vmem_est, 32 * 2 ** 20), 64 * 2 ** 20))

    out_flat = pl.pallas_call(
        functools.partial(_fused_block_kernel, H=H, W=W,
                          act1=activation_fn1, act2=activation_fn2,
                          use_skip=use_skip_connection,
                          m2_shortcut=(activation_fn1 == "None")),
        out_shape=jax.ShapeDtypeStruct((N, Cout_p, HW), jnp.float32),
        grid_spec=pltpu.PrefetchScalarGridSpec(
            num_scalar_prefetch=0,
            grid=(N, nkb),
            in_specs=in_specs,
            out_specs=pl.BlockSpec((1, Cout_p, HW), lambda n, k: (n, 0, 0)),
            scratch_shapes=[pltpu.VMEM((Cout_p, HW), jnp.float32)],   # 1x1-conv accumulator
        ),
        compiler_params=pltpu.CompilerParams(
            dimension_semantics=("parallel", "arbitrary"),
            vmem_limit_bytes=vmem_limit),
        cost_estimate=pl.CostEstimate(flops=int(flops),
                                      transcendentals=int(transcendentals),
                                      bytes_accessed=int(bytes_accessed)),
    )(*inputs)

    out = out_flat[:, :Cout, :].reshape(N, Cout, H, W)
    return out.astype(x.dtype)


# ---------------- pure-JAX reference (for correctness check) ----------------
def _inst_norm_ref(v, g, b):
    mean = v.mean(axis=(2, 3), keepdims=True)
    var = v.var(axis=(2, 3), keepdims=True)  # biased, like PyTorch InstanceNorm
    return (v - mean) / jnp.sqrt(var + EPS) * g[None, :, None, None] + b[None, :, None, None]


def mobile_v1_block_ref(x, params, *, kernel_size=3, use_skip_connection=True,
                        activation_fn1="None", activation_fn2="None"):
    w1, b1, g1, be1 = params["w1"], params["b1"], params["g1"], params["be1"]
    w2, b2, g2, be2 = params["w2"], params["b2"], params["g2"], params["be2"]
    N, C, H, W = x.shape
    K = kernel_size
    p = K // 2
    xpad = jnp.pad(x, ((0, 0), (0, 0), (p, p), (p, p)), mode="reflect")
    y = lax.conv_general_dilated(
        xpad, w1.reshape(C, 1, K, K), window_strides=(1, 1), padding="VALID",
        dimension_numbers=("NCHW", "OIHW", "NCHW"), feature_group_count=C,
    ) + b1[None, :, None, None]
    y = _apply_act(activation_fn1, _inst_norm_ref(y, g1, be1))
    z = lax.conv_general_dilated(
        y, w2[:, :, None, None], window_strides=(1, 1), padding="VALID",
        dimension_numbers=("NCHW", "OIHW", "NCHW"),
    ) + b2[None, :, None, None]
    z = _apply_act(activation_fn2, _inst_norm_ref(z, g2, be2))
    return z + x if use_skip_connection else z


def _make_params(key, cin, cout, k):
    keys = jax.random.split(key, 8)
    return {
        "w1": 0.2 * jax.random.normal(keys[0], (cin, k, k), jnp.float32),
        "b1": 0.1 * jax.random.normal(keys[1], (cin,), jnp.float32),
        "g1": 1.0 + 0.1 * jax.random.normal(keys[2], (cin,), jnp.float32),
        "be1": 0.1 * jax.random.normal(keys[3], (cin,), jnp.float32),
        "w2": 0.2 * jax.random.normal(keys[4], (cout, cin), jnp.float32),
        "b2": 0.1 * jax.random.normal(keys[5], (cout,), jnp.float32),
        "g2": 1.0 + 0.1 * jax.random.normal(keys[6], (cout,), jnp.float32),
        "be2": 0.1 * jax.random.normal(keys[7], (cout,), jnp.float32),
    }


def _check(key, *, N, Cin, Cout, H, W, skip, act1, act2, cin_block=None):
    kx, kp = jax.random.split(key)
    x = jax.random.normal(kx, (N, Cin, H, W), jnp.float32)
    params = _make_params(kp, Cin, Cout, 3)
    out = mobile_v1_block(x, params, kernel_size=3, use_skip_connection=skip,
                          activation_fn1=act1, activation_fn2=act2, cin_block=cin_block)
    out = jax.block_until_ready(out)
    ref = mobile_v1_block_ref(x, params, kernel_size=3, use_skip_connection=skip,
                              activation_fn1=act1, activation_fn2=act2)
    assert out.shape == (N, Cout, H, W)
    err = float(jnp.max(jnp.abs(out - ref)))
    assert jnp.allclose(out, ref, atol=1e-4, rtol=1e-4), err
    return err


if __name__ == "__main__":
    key = jax.random.PRNGKey(0)
    k1, k2, k3 = jax.random.split(key, 3)

    # 1) Module default config: skip connection, no activations.
    _check(k1, N=2, Cin=4, Cout=4, H=16, W=16, skip=True, act1="None", act2="None")
    # 2) No skip, Cout != Cin (exercises channel padding + in-kernel m2 reduction path).
    _check(k2, N=2, Cin=4, Cout=6, H=16, W=16, skip=False, act1="ReLU", act2="Sigmoid")
    # 3) Multi Cin-block path (nkb=2) with the accumulator + finalize structure.
    _check(k3, N=2, Cin=16, Cout=16, H=16, W=16, skip=True, act1="None", act2="ELU",
           cin_block=8)

    print("KERNEL_OK")
</pallas_src>

<mosaic_0001>
module attributes {stable_mosaic.version = 11 : i64} {
  func.func @_fused_block_kernel(%arg0: i32, %arg1: i32, %arg2: memref<1x8x256xf32, #tpu.memory_space<vmem>>, %arg3: memref<1x8x256xf32, #tpu.memory_space<vmem>>, %arg4: memref<2x256xi32, #tpu.memory_space<vmem>>, %arg5: memref<8x9xf32, #tpu.memory_space<vmem>>, %arg6: memref<8x1xf32, #tpu.memory_space<vmem>>, %arg7: memref<8x1xf32, #tpu.memory_space<vmem>>, %arg8: memref<1x8x8xf32, #tpu.memory_space<vmem>>, %arg9: memref<8x1xf32, #tpu.memory_space<vmem>>, %arg10: memref<8x1xf32, #tpu.memory_space<vmem>>, %arg11: memref<8x1xf32, #tpu.memory_space<vmem>>, %arg12: memref<1x8x256xf32, #tpu.memory_space<vmem>>, %arg13: memref<8x256xf32, #tpu.memory_space<vmem>>) attributes {dimension_semantics = [#tpu.dimension_semantics<parallel>, #tpu.dimension_semantics<arbitrary>], iteration_bounds = array<i64: 2, 1>, scalar_prefetch = 0 : i64, scratch_operands = 1 : i64, tpu.core_type = #tpu.core_type<tc>, window_params = [{transform_indices = @transform_0, window_bounds = array<i64: 1, 8, 256>}, {transform_indices = @transform_1, window_bounds = array<i64: 1, 8, 256>}, {pipeline_mode = #tpu.pipeline_mode<synchronous>, transform_indices = @transform_2, window_bounds = array<i64: 2, 256>}, {transform_indices = @transform_3, window_bounds = array<i64: 8, 9>}, {transform_indices = @transform_4, window_bounds = array<i64: 8, 1>}, {transform_indices = @transform_5, window_bounds = array<i64: 8, 1>}, {transform_indices = @transform_6, window_bounds = array<i64: 1, 8, 8>}, {pipeline_mode = #tpu.pipeline_mode<synchronous>, transform_indices = @transform_7, window_bounds = array<i64: 8, 1>}, {pipeline_mode = #tpu.pipeline_mode<synchronous>, transform_indices = @transform_8, window_bounds = array<i64: 8, 1>}, {pipeline_mode = #tpu.pipeline_mode<synchronous>, transform_indices = @transform_9, window_bounds = array<i64: 8, 1>}, {transform_indices = @transform_10, window_bounds = array<i64: 1, 8, 256>}]} {
    %c0_i32 = arith.constant 0 : i32
    %0 = arith.cmpi eq, %arg1, %c0_i32 : i32
    %1 = arith.extui %0 : i1 to i32
    %c0_i32_0 = arith.constant 0 : i32
    %2 = arith.cmpi ne, %1, %c0_i32_0 : i32
    scf.if %2 {
      %cst_31 = arith.constant 0.000000e+00 : f32
      %100 = vector.broadcast %cst_31 : f32 to vector<8x256xf32>
      %c0_32 = arith.constant 0 : index
      %c0_33 = arith.constant 0 : index
      %101 = vector.load %arg13[%c0_32, %c0_33] : memref<8x256xf32, #tpu.memory_space<vmem>>, vector<8x256xf32>
      tpu.vector_store %arg13[%c0_32, %c0_33], %100 {strides = array<i32>} : memref<8x256xf32, #tpu.memory_space<vmem>>, vector<8x256xf32>,
    } else {
    }
    %c0 = arith.constant 0 : index
    %c0_1 = arith.constant 0 : index
    %c0_2 = arith.constant 0 : index
    %3 = vector.load %arg2[%c0, %c0_1, %c0_2] : memref<1x8x256xf32, #tpu.memory_space<vmem>>, vector<1x8x256xf32>
    %4 = vector.shape_cast %3 : vector<1x8x256xf32> to vector<8x256xf32>
    %c0_3 = arith.constant 0 : index
    %c0_4 = arith.constant 0 : index
    %5 = vector.load %arg4[%c0_3, %c0_4] : memref<2x256xi32, #tpu.memory_space<vmem>>, vector<1x256xi32>
    %c1 = arith.constant 1 : index
    %c0_5 = arith.constant 0 : index
    %6 = vector.load %arg4[%c1, %c0_5] : memref<2x256xi32, #tpu.memory_space<vmem>>, vector<1x256xi32>
    %c0_i32_6 = arith.constant 0 : i32
    %7 = vector.broadcast %c0_i32_6 : i32 to vector<1x256xi32>
    %8 = arith.cmpi eq, %6, %7 : vector<1x256xi32>
    %c15_i32 = arith.constant 15 : i32
    %9 = vector.broadcast %c15_i32 : i32 to vector<1x256xi32>
    %10 = arith.cmpi eq, %6, %9 : vector<1x256xi32>
    %c0_i32_7 = arith.constant 0 : i32
    %11 = vector.broadcast %c0_i32_7 : i32 to vector<1x256xi32>
    %12 = arith.cmpi eq, %5, %11 : vector<1x256xi32>
    %c15_i32_8 = arith.constant 15 : i32
    %13 = vector.broadcast %c15_i32_8 : i32 to vector<1x256xi32>
    %14 = arith.cmpi eq, %5, %13 : vector<1x256xi32>
    %c1_i32 = arith.constant 1 : i32
    %15 = tpu.dynamic_rotate %4 by %c1_i32 dim 1 : vector<8x256xf32>, i32 -> vector<8x256xf32>
    %c255_i32 = arith.constant 255 : i32
    %16 = tpu.dynamic_rotate %4 by %c255_i32 dim 1 : vector<8x256xf32>, i32 -> vector<8x256xf32>
    %17 = vector.shape_cast %8 : vector<1x256xi1> to vector<1x256xi1>
    %18 = vector.broadcast %17 : vector<1x256xi1> to vector<8x256xi1>
    %19 = arith.select %18, %16, %15 : vector<8x256xi1>, vector<8x256xf32>
    %20 = vector.shape_cast %10 : vector<1x256xi1> to vector<1x256xi1>
    %21 = vector.broadcast %20 : vector<1x256xi1> to vector<8x256xi1>
    %22 = arith.select %21, %15, %16 : vector<8x256xi1>, vector<8x256xf32>
    %c0_9 = arith.constant 0 : index
    %c0_10 = arith.constant 0 : index
    %23 = vector.load %arg5[%c0_9, %c0_10] : memref<8x9xf32, #tpu.memory_space<vmem>>, vector<8x9xf32>
    %24 = vector.extract_strided_slice %23 {offsets = [0, 0], sizes = [8, 1], strides = [1, 1]} : vector<8x9xf32> to vector<8x1xf32>
    %25 = vector.broadcast %24 : vector<8x1xf32> to vector<8x256xf32>
    %26 = arith.mulf %19, %25 : vector<8x256xf32>
    %27 = vector.extract_strided_slice %23 {offsets = [0, 1], sizes = [8, 1], strides = [1, 1]} : vector<8x9xf32> to vector<8x1xf32>
    %28 = vector.broadcast %27 : vector<8x1xf32> to vector<8x256xf32>
    %29 = arith.mulf %4, %28 : vector<8x256xf32>
    %30 = arith.addf %26, %29 : vector<8x256xf32>
    %31 = vector.extract_strided_slice %23 {offsets = [0, 2], sizes = [8, 1], strides = [1, 1]} : vector<8x9xf32> to vector<8x1xf32>
    %32 = vector.broadcast %31 : vector<8x1xf32> to vector<8x256xf32>
    %33 = arith.mulf %22, %32 : vector<8x256xf32>
    %34 = arith.addf %30, %33 : vector<8x256xf32>
    %35 = vector.extract_strided_slice %23 {offsets = [0, 3], sizes = [8, 1], strides = [1, 1]} : vector<8x9xf32> to vector<8x1xf32>
    %36 = vector.broadcast %35 : vector<8x1xf32> to vector<8x256xf32>
    %37 = arith.mulf %19, %36 : vector<8x256xf32>
    %38 = vector.extract_strided_slice %23 {offsets = [0, 4], sizes = [8, 1], strides = [1, 1]} : vector<8x9xf32> to vector<8x1xf32>
    %39 = vector.broadcast %38 : vector<8x1xf32> to vector<8x256xf32>
    %40 = arith.mulf %4, %39 : vector<8x256xf32>
    %41 = arith.addf %37, %40 : vector<8x256xf32>
    %42 = vector.extract_strided_slice %23 {offsets = [0, 5], sizes = [8, 1], strides = [1, 1]} : vector<8x9xf32> to vector<8x1xf32>
    %43 = vector.broadcast %42 : vector<8x1xf32> to vector<8x256xf32>
    %44 = arith.mulf %22, %43 : vector<8x256xf32>
    %45 = arith.addf %41, %44 : vector<8x256xf32>
    %46 = vector.extract_strided_slice %23 {offsets = [0, 6], sizes = [8, 1], strides = [1, 1]} : vector<8x9xf32> to vector<8x1xf32>
    %47 = vector.broadcast %46 : vector<8x1xf32> to vector<8x256xf32>
    %48 = arith.mulf %19, %47 : vector<8x256xf32>
    %49 = vector.extract_strided_slice %23 {offsets = [0, 7], sizes = [8, 1], strides = [1, 1]} : vector<8x9xf32> to vector<8x1xf32>
    %50 = vector.broadcast %49 : vector<8x1xf32> to vector<8x256xf32>
    %51 = arith.mulf %4, %50 : vector<8x256xf32>
    %52 = arith.addf %48, %51 : vector<8x256xf32>
    %53 = vector.extract_strided_slice %23 {offsets = [0, 8], sizes = [8, 1], strides = [1, 1]} : vector<8x9xf32> to vector<8x1xf32>
    %54 = vector.broadcast %53 : vector<8x1xf32> to vector<8x256xf32>
    %55 = arith.mulf %22, %54 : vector<8x256xf32>
    %56 = arith.addf %52, %55 : vector<8x256xf32>
    %c16_i32 = arith.constant 16 : i32
    %57 = tpu.dynamic_rotate %34 by %c16_i32 dim 1 : vector<8x256xf32>, i32 -> vector<8x256xf32>
    %c240_i32 = arith.constant 240 : i32
    %58 = tpu.dynamic_rotate %34 by %c240_i32 dim 1 : vector<8x256xf32>, i32 -> vector<8x256xf32>
    %c16_i32_11 = arith.constant 16 : i32
    %59 = tpu.dynamic_rotate %56 by %c16_i32_11 dim 1 : vector<8x256xf32>, i32 -> vector<8x256xf32>
    %c240_i32_12 = arith.constant 240 : i32
    %60 = tpu.dynamic_rotate %56 by %c240_i32_12 dim 1 : vector<8x256xf32>, i32 -> vector<8x256xf32>
    %61 = vector.shape_cast %12 : vector<1x256xi1> to vector<1x256xi1>
    %62 = vector.broadcast %61 : vector<1x256xi1> to vector<8x256xi1>
    %63 = arith.select %62, %58, %57 : vector<8x256xi1>, vector<8x256xf32>
    %64 = arith.addf %63, %45 : vector<8x256xf32>
    %65 = vector.shape_cast %14 : vector<1x256xi1> to vector<1x256xi1>
    %66 = vector.broadcast %65 : vector<1x256xi1> to vector<8x256xi1>
    %67 = arith.select %66, %59, %60 : vector<8x256xi1>, vector<8x256xf32>
    %68 = arith.addf %64, %67 : vector<8x256xf32>
    %cst = arith.constant dense<0.000000e+00> : vector<8xf32>
    %69 = vector.multi_reduction <add>, %68, %cst [1] : vector<8x256xf32> to vector<8xf32>
    %70 = vector.shape_cast %69 : vector<8xf32> to vector<8x1xf32>
    %cst_13 = arith.constant 3.906250e-03 : f32
    %71 = vector.broadcast %cst_13 : f32 to vector<8x1xf32>
    %72 = arith.mulf %70, %71 : vector<8x1xf32>
    %73 = vector.broadcast %72 : vector<8x1xf32> to vector<8x256xf32>
    %74 = arith.subf %68, %73 : vector<8x256xf32>
    %75 = arith.mulf %74, %74 : vector<8x256xf32>
    %cst_14 = arith.constant dense<0.000000e+00> : vector<8xf32>
    %76 = vector.multi_reduction <add>, %75, %cst_14 [1] : vector<8x256xf32> to vector<8xf32>
    %77 = vector.shape_cast %76 : vector<8xf32> to vector<8x1xf32>
    %cst_15 = arith.constant 3.906250e-03 : f32
    %78 = vector.broadcast %cst_15 : f32 to vector<8x1xf32>
    %79 = arith.mulf %77, %78 : vector<8x1xf32>
    %cst_16 = arith.constant 9.99999974E-6 : f32
    %80 = vector.broadcast %cst_16 : f32 to vector<8x1xf32>
    %81 = arith.addf %79, %80 : vector<8x1xf32>
    %82 = math.rsqrt %81 : vector<8x1xf32>
    %83 = vector.broadcast %82 : vector<8x1xf32> to vector<8x256xf32>
    %84 = arith.mulf %74, %83 : vector<8x256xf32>
    %c0_17 = arith.constant 0 : index
    %c0_18 = arith.constant 0 : index
    %85 = vector.load %arg6[%c0_17, %c0_18] : memref<8x1xf32, #tpu.memory_space<vmem>>, vector<8x1xf32>
    %86 = vector.broadcast %85 : vector<8x1xf32> to vector<8x256xf32>
    %87 = arith.mulf %84, %86 : vector<8x256xf32>
    %c0_19 = arith.constant 0 : index
    %c0_20 = arith.constant 0 : index
    %88 = vector.load %arg7[%c0_19, %c0_20] : memref<8x1xf32, #tpu.memory_space<vmem>>, vector<8x1xf32>
    %89 = vector.broadcast %88 : vector<8x1xf32> to vector<8x256xf32>
    %90 = arith.addf %87, %89 : vector<8x256xf32>
    %c0_21 = arith.constant 0 : index
    %c0_22 = arith.constant 0 : index
    %91 = vector.load %arg13[%c0_21, %c0_22] : memref<8x256xf32, #tpu.memory_space<vmem>>, vector<8x256xf32>
    %c0_23 = arith.constant 0 : index
    %c0_24 = arith.constant 0 : index
    %c0_25 = arith.constant 0 : index
    %92 = vector.load %arg8[%c0_23, %c0_24, %c0_25] : memref<1x8x8xf32, #tpu.memory_space<vmem>>, vector<1x8x8xf32>
    %93 = vector.shape_cast %92 : vector<1x8x8xf32> to vector<8x8xf32>
    %cst_26 = arith.constant dense<0.000000e+00> : vector<8x256xf32>
    %94 = tpu.matmul %93, %90, %cst_26 {dimension_numbers = #tpu.dot_dimension_numbers<[1], [0], [0], [1], [0, 0, 1, 1], [], []>} : vector<8x8xf32>, vector<8x256xf32>, vector<8x256xf32> -> vector<8x256xf32>
    %95 = arith.addf %91, %94 : vector<8x256xf32>
    %c0_27 = arith.constant 0 : index
    %c0_28 = arith.constant 0 : index
    %96 = vector.load %arg13[%c0_27, %c0_28] : memref<8x256xf32, #tpu.memory_space<vmem>>, vector<8x256xf32>
    tpu.vector_store %arg13[%c0_27, %c0_28], %95 {strides = array<i32>} : memref<8x256xf32, #tpu.memory_space<vmem>>, vector<8x256xf32>,
    %c0_i32_29 = arith.constant 0 : i32
    %97 = arith.cmpi eq, %arg1, %c0_i32_29 : i32
    %98 = arith.extui %97 : i1 to i32
    %c0_i32_30 = arith.constant 0 : i32
    %99 = arith.cmpi ne, %98, %c0_i32_30 : i32
    scf.if %99 {
      %c0_31 = arith.constant 0 : index
      %c0_32 = arith.constant 0 : index
      %100 = vector.load %arg13[%c0_31, %c0_32] : memref<8x256xf32, #tpu.memory_space<vmem>>, vector<8x256xf32>
      %c0_33 = arith.constant 0 : index
      %c0_34 = arith.constant 0 : index
      %101 = vector.load %arg11[%c0_33, %c0_34] : memref<8x1xf32, #tpu.memory_space<vmem>>, vector<8x1xf32>
      %102 = vector.broadcast %101 : vector<8x1xf32> to vector<8x256xf32>
      %103 = arith.subf %100, %102 : vector<8x256xf32>
      %104 = arith.mulf %103, %103 : vector<8x256xf32>
      %cst_35 = arith.constant dense<0.000000e+00> : vector<8xf32>
      %105 = vector.multi_reduction <add>, %104, %cst_35 [1] : vector<8x256xf32> to vector<8xf32>
      %106 = vector.shape_cast %105 : vector<8xf32> to vector<8x1xf32>
      %cst_36 = arith.constant 3.906250e-03 : f32
      %107 = vector.broadcast %cst_36 : f32 to vector<8x1xf32>
      %108 = arith.mulf %106, %107 : vector<8x1xf32>
      %cst_37 = arith.constant 9.99999974E-6 : f32
      %109 = vector.broadcast %cst_37 : f32 to vector<8x1xf32>
      %110 = arith.addf %108, %109 : vector<8x1xf32>
      %111 = math.rsqrt %110 : vector<8x1xf32>
      %112 = vector.broadcast %111 : vector<8x1xf32> to vector<8x256xf32>
      %113 = arith.mulf %103, %112 : vector<8x256xf32>
      %c0_38 = arith.constant 0 : index
      %c0_39 = arith.constant 0 : index
      %114 = vector.load %arg9[%c0_38, %c0_39] : memref<8x1xf32, #tpu.memory_space<vmem>>, vector<8x1xf32>
      %115 = vector.broadcast %114 : vector<8x1xf32> to vector<8x256xf32>
      %116 = arith.mulf %113, %115 : vector<8x256xf32>
      %c0_40 = arith.constant 0 : index
      %c0_41 = arith.constant 0 : index
      %117 = vector.load %arg10[%c0_40, %c0_41] : memref<8x1xf32, #tpu.memory_space<vmem>>, vector<8x1xf32>
      %118 = vector.broadcast %117 : vector<8x1xf32> to vector<8x256xf32>
      %119 = arith.addf %116, %118 : vector<8x256xf32>
      %c0_42 = arith.constant 0 : index
      %c0_43 = arith.constant 0 : index
      %c0_44 = arith.constant 0 : index
      %120 = vector.load %arg3[%c0_42, %c0_43, %c0_44] : memref<1x8x256xf32, #tpu.memory_space<vmem>>, vector<1x8x256xf32>
      %121 = vector.shape_cast %120 : vector<1x8x256xf32> to vector<8x256xf32>
      %122 = arith.addf %119, %121 : vector<8x256xf32>
      %c0_45 = arith.constant 0 : index
      %c0_46 = arith.constant 0 : index
      %c0_47 = arith.constant 0 : index
      %123 = vector.load %arg12[%c0_45, %c0_46, %c0_47] : memref<1x8x256xf32, #tpu.memory_space<vmem>>, vector<1x8x256xf32>
      %124 = vector.shape_cast %123 : vector<1x8x256xf32> to vector<8x256xf32>
      %125 = vector.shape_cast %122 : vector<8x256xf32> to vector<1x8x256xf32>
      tpu.vector_store %arg12[%c0_45, %c0_46, %c0_47], %125 {strides = array<i32>} : memref<1x8x256xf32, #tpu.memory_space<vmem>>, vector<1x8x256xf32>,
    } else {
    }
    return
  }
  func.func @transform_0(%arg0: i32, %arg1: i32) -> (i32, i32, i32) {
    %c0_i32 = arith.constant 0 : i32
    %c0_i32_0 = arith.constant 0 : i32
    return %arg0, %arg1, %c0_i32 : i32, i32, i32
  }
  func.func @transform_1(%arg0: i32, %arg1: i32) -> (i32, i32, i32) {
    %c0_i32 = arith.constant 0 : i32
    %c0_i32_0 = arith.constant 0 : i32
    %c0_i32_1 = arith.constant 0 : i32
    return %arg0, %c0_i32, %c0_i32_0 : i32, i32, i32
  }
  func.func @transform_2(%arg0: i32, %arg1: i32) -> (i32, i32) {
    %c0_i32 = arith.constant 0 : i32
    %c0_i32_0 = arith.constant 0 : i32
    %c0_i32_1 = arith.constant 0 : i32
    return %c0_i32, %c0_i32_0 : i32, i32
  }
  func.func @transform_3(%arg0: i32, %arg1: i32) -> (i32, i32) {
    %c0_i32 = arith.constant 0 : i32
    %c0_i32_0 = arith.constant 0 : i32
    return %arg1, %c0_i32 : i32, i32
  }
  func.func @transform_4(%arg0: i32, %arg1: i32) -> (i32, i32) {
    %c0_i32 = arith.constant 0 : i32
    %c0_i32_0 = arith.constant 0 : i32
    return %arg1, %c0_i32 : i32, i32
  }
  func.func @transform_5(%arg0: i32, %arg1: i32) -> (i32, i32) {
    %c0_i32 = arith.constant 0 : i32
    %c0_i32_0 = arith.constant 0 : i32
    return %arg1, %c0_i32 : i32, i32
  }
  func.func @transform_6(%arg0: i32, %arg1: i32) -> (i32, i32, i32) {
    %c0_i32 = arith.constant 0 : i32
    %c0_i32_0 = arith.constant 0 : i32
    %c0_i32_1 = arith.constant 0 : i32
    return %arg1, %c0_i32, %c0_i32_0 : i32, i32, i32
  }
  func.func @transform_7(%arg0: i32, %arg1: i32) -> (i32, i32) {
    %c0_i32 = arith.constant 0 : i32
    %c0_i32_0 = arith.constant 0 : i32
    %c0_i32_1 = arith.constant 0 : i32
    return %c0_i32, %c0_i32_0 : i32, i32
  }
  func.func @transform_8(%arg0: i32, %arg1: i32) -> (i32, i32) {
    %c0_i32 = arith.constant 0 : i32
    %c0_i32_0 = arith.constant 0 : i32
    %c0_i32_1 = arith.constant 0 : i32
    return %c0_i32, %c0_i32_0 : i32, i32
  }
  func.func @transform_9(%arg0: i32, %arg1: i32) -> (i32, i32) {
    %c0_i32 = arith.constant 0 : i32
    %c0_i32_0 = arith.constant 0 : i32
    %c0_i32_1 = arith.constant 0 : i32
    return %c0_i32, %c0_i32_0 : i32, i32
  }
  func.func @transform_10(%arg0: i32, %arg1: i32) -> (i32, i32, i32) {
    %c0_i32 = arith.constant 0 : i32
    %c0_i32_0 = arith.constant 0 : i32
    %c0_i32_1 = arith.constant 0 : i32
    return %arg0, %c0_i32, %c0_i32_0 : i32, i32, i32
  }
}

</mosaic_0001>

<bundles_post_ra>
// kernel: tpu_custom_call.1
= control target key start
LH: loop header
LB: loop body
LE: loop exit
PB: predicated region body
PF: predicated region fallthrough
CT: control target
= control target key end

     0   :  { %15 = vsyncpa [#allocation4], 0  ;;  %s1573_s0 = inlined_call_operand.vmem [shape: f32[2,8,256], index: 0, kind: input, shape index: {}]   ;;  %s1574_s1 = inlined_call_operand.hbm [shape: f32[2,8,256], index: 1, kind: input, shape index: {}]   ;;  %s1575_s2 = inlined_call_operand.vmem [shape: s32[2,256], index: 2, kind: input, shape index: {}]   ;;  %s1576_s3 = inlined_call_operand.vmem [shape: f32[8,9], index: 3, kind: input, shape index: {}]   ;;  %s1577_s4 = inlined_call_operand.vmem [shape: f32[8,1], index: 4, kind: input, shape index: {}]   ;;  %s1578_s5 = inlined_call_operand.vmem [shape: f32[8,1], index: 5, kind: input, shape index: {}]   ;;  %s1579_s6 = inlined_call_operand.vmem [shape: f32[1,8,8], index: 6, kind: input, shape index: {}]   ;;  %s1580_s7 = inlined_call_operand.vmem [shape: f32[8,1], index: 7, kind: input, shape index: {}]   ;;  %s1581_s8 = inlined_call_operand.vmem [shape: f32[8,1], index: 8, kind: input, shape index: {}]   ;;  %s1582_s9 = inlined_call_operand.vmem [shape: f32[8,1], index: 9, kind: input, shape index: {}]   ;;  %s1583_s10 = inlined_call_operand.hbm [shape: f32[2,8,256], index: 10, kind: output, shape index: {}]  }
   0x1   :  { %17 = vsyncpa [#allocation4 + $0x1], 0 }
   0x2   :  { %18 = vsyncpa [#allocation5], 0 }
   0x3   :  { %20 = vsyncpa [#allocation5 + $0x1], 0  ;;  %s1306_s13 = smov 0   ;;  %s1308_s14 = smov 0  }
   0x4   :  { %s1310_s15 = smov 0   ;;  %s1312_s16 = smov 0  }
   0x5   :  { %s1314_s17 = smov 0   ;;  %s1316_s18 = smov 0  }
   0x6 LB: > { %1587 = sst [smem:[#allocation9_spill]] %s1229_s17  ;;  %s1004_s19 = sadd.s32 4294967295, %s1233_s18   ;;  %s1233_s18 = sphi %s1316_s18, %s26_s18   ;;  %s1229_s17 = sphi %s1314_s17, %s1600_s17   ;;  %s1225_s16 = sphi %s1312_s16, %s1599_s16   ;;  %s1221_s15 = sphi %s1310_s15, %s1603_s15   ;;  %s1217_s14 = sphi %s1308_s14, %s1602_s14   ;;  %s1213_s13 = sphi %s1306_s13, %s1601_s13  }
   0x7   : > { %s1005_s20 = sadd.s32 4294967294, %s1233_s18   ;;  %s38_s21 = sadd.s32 1, %s1229_s17 }
   0x8   : > { %s73_s22 = sadd.s32 1, %s1221_s15  ;;  %p40_p0 = scmp.ge.s32.totalorder %s38_s21, 2 }
   0x9   : > { %p80_p1 = scmp.ne.s32.totalorder %s1221_s15, %s1217_s14  ;;  %p81_p2 = scmp.eq.s32.totalorder %s1233_s18, 0 }
   0xa   : > { %p86_p3 = scmp.ne.s32.totalorder %s1217_s14, %s1213_s13  ;;  %s1605_s21 = smov (%p40_p0, %s38_s21), 0 }
   0xb   : > { %1588 = sst [smem:[#allocation10_spill]] %s1605_s21  ;;  %p1347_p4 = por %p81_p2, %p80_p1 }
   0xc   : > { %p87_p5 = scmp.eq.s32.totalorder %s1004_s19, 0  ;;  %s70_s24 = ssub.s32 %s1229_s17, %s1605_s21 }
   0xd   : > { %p298_p6 = scmp.eq.s32.totalorder %s1004_s19, 1  ;;  %p71_p7 = scmp.eq.s32.totalorder %s70_s24, 0 }
   0xe   : > { %p1353_p8 = por %p87_p5, %p86_p3  ;;  %p304_p10 = scmp.eq.s32.totalorder %s1005_s20, 1 }
   0xf   : > { %p1357_p9 = por %p298_p6, %p80_p1  ;;  %p1042_p13 = scmp.lt.s32.totalorder %s1233_s18, 2 }
  0x10   : > { %s1362_s27 = scalar_select %p71_p7, %s1221_s15, %s73_s22  }
  0x11   : > { %s1591_s26 = scalar_select %p1357_p9, 1, 0 }
  0x12   : > { %p1364_p11 = por %p304_p10, %p86_p3  ;;  %s376_s29 = sand.u32 1, %s1221_s15  }
  0x13   : > { %s1012_s30 = sshll.u32 %s376_s29, 4  ;;  %s1027_s11 = sshll.u32 %s1229_s17, 8 }
  0x14   : > { %s1592_s28 = scalar_select %p1364_p11, 1, 0 }
  0x15   : > { %s1375_s24 = scalar_lea.hbm %s1574_s1, %s1027_s11  ;;  %s380_s20 = scalar_lea.vmem [#allocation3], %s1012_s30 }
  0x16   : > { %s388_s22 = sshll.u32 %s380_s20, 4  ;;  %p1381_p0 = pnand %p1042_p13, %p1347_p4  ;;  %s1377_s22 = int_to_ptr.vmem [resolvable:$true] %s388_s22 }
  0x17   : > { %s377_s12 = scalar_lea.sflag [#allocation4], %s376_s29  ;;  %s1121_s11 = scalar_lea.hbm %s1375_s24, 256 }
  0x18   : > { %p1122_p3 = scmp.ne.s32.totalorder %s1375_s24, %s1121_s11  ;;  %p1123_p5 = pneg %p1381_p0 }
  0x19   : > { %s1126_s23 = scalar_lea.hbm %s1574_s1, 512  ;;  %p1127_p4 = scmp.lt.u32.totalorder %s1375_s24, %s1574_s1 }
  0x1a   : > { %p1124_p6 = pnand %p1123_p5, %p1122_p3  ;;  %p1128_p10 = scmp.lt.u32.totalorder %s1126_s23, %s1121_s11 }
  0x1b   : > { %p1130_p12 = scmp.lt.u32.totalorder %s1121_s11, %s1375_s24 }
  0x1c   : > { %p1125_p7 = pneg %p1124_p6  ;;  %p1129_p13 = por %p1128_p10, %p1127_p4 }
  0x1e   : > { %p1131_p1 = por %p1130_p12, %p1129_p13 }
  0x20   : > { %p1132_p2 = pnand %p1131_p1, %p1125_p7 }
  0x22   : > { %1135 = shalt.err (!%p1132_p2)
}
  0x23   : > { %s1136_s29 = scalar_lea.vmem %s1377_s22, 256  ;;  %s1235_s30 = smov [#allocation3]  }
  0x24   : > { %p1137_p3 = scmp.ne.s32.totalorder %s1377_s22, %s1136_s29  ;;  %s1141_s19 = sshll.u32 %s1235_s30, 4  ;;  %s1142_s19 = int_to_ptr.vmem [resolvable:$false] %s1141_s19 }
  0x25   : > { %s1143_s17 = scalar_lea.vmem %s1142_s19, 512  ;;  %p1144_p9 = scmp.lt.s32.totalorder %s1377_s22, %s1142_s19 }
  0x26   : > { %p1139_p6 = pnand %p1137_p3, %p1123_p5  ;;  %p1145_p4 = scmp.lt.s32.totalorder %s1143_s17, %s1136_s29 }
  0x28   : > { %p1140_p11 = pneg %p1139_p6  ;;  %p1146_p10 = por %p1145_p4, %p1144_p9 }
  0x2a   : > { %p1147_p12 = pnand %p1146_p10, %p1140_p11 }
  0x2c   : > { %1150 = shalt.err (!%p1147_p12)
}
  0x2d   : > { %1037 = dma.hbm_to_vmem [thread:$0]  (!%p1381_p0), %s1375_s24, 256, %s1377_s22, %s377_s12  }
  0x2e   : > { %p1594_p1 = scmp.lt.s32.totalorder %s1233_s18, 3  ;;  %p1595_p2 = scmp.ge.s32.totalorder %s1233_s18, 1 }
  0x30   : > { %p394_p5 = pnand %p1595_p2, %p1594_p1 }
  0x31   : > { %s1417_s11 = sand.u32 (!%p394_p5), 1, %s1217_s14  }
  0x32   : > { %397 = sbr.rel (%p394_p5) target bundleno = 1064 (0x428), region = 60  ;;  %s1016_s23 = sshll.u32 (!%p394_p5), %s1417_s11, 4 }
  0x33   : > { %s400_s20 = scalar_lea.sflag (!%p394_p5), [#allocation4], %s1417_s11  ;;  %s1423_s21 = scalar_lea.vmem (!%p394_p5), [#allocation3], %s1016_s23 }
  0x39   : > { %1204 = dma.done.wait (%p1353_p8), %s400_s20, 256  }
  0x3a   : > { %1206 = vsyncadd (%p1353_p8), %s400_s20, 4294967040  ;;  %v1236_v0 = vmov 2   ;;  %v1237_v1 = vmov 0   ;;  %p465_p9 = scmp.lt.s32.totalorder %s1225_s16, 1  ;;  %v547_v2 = vld [vmem:[%s1576_s3] sm:$0xff]  ;;  %v1238_v3 = vmov 6   ;;  %v509_v15 = vlaneseq }
  0x3b   : > { %1108 = vset.pattern.permute.xlu1 %v1236_v0  ;;  %1106 = vset.pattern.permute.xlu0 %v1237_v1  ;;  %v1239_v4 = vmov 1   ;;  %v1240_v5 = vmov 7   ;;  %v1241_v6 = vmov 8   ;;  %s1242_s17 = smov 1   ;;  %s1243_s20 = smov 127   ;;  %v1244_v9 = vmov 3  }
  0x3c   : > { %564 = vperm.xlu1 %1108, %v547_v2   ;;  %550 = vperm.xlu0 %1106, %v547_v2   ;;  %s466_s12 = scalar_select %p465_p9, %s1225_s16, 1  ;;  %v1245_v10 = vmov 4   ;;  %v1246_v11 = vmov 5   ;;  %v1020_v16 = vld [vmem:[%s1575_s2 + $0x1] ss:$2 sm:$0x3] }
  0x3d   : > { %v523_v18 = vshrl.u32 %v509_v15, 7  ;;  %vm502_vm0 = vcmp.eq.s32.totalorder %v1020_v16, 15  ;;  %vm501_vm1 = vcmp.eq.s32.totalorder %v1020_v16, 0  ;;  %v1457_v26 = vand.u32 127, %v509_v15  ;;  %s1029_s24 = sshll.u32 %s1225_s16, 8  ;;  %s464_s22 = scalar_lea.vmem [#allocation6], %s1016_s23 }
  0x3e   : > { %s1028_s25 = sshll.u32 %s466_s12, 4  ;;  %v534_v23 = vsel %vm502_vm0, 1, %v1237_v1  ;;  %v521_v24 = vsel %vm501_vm1, 1, %v1237_v1  ;;  %s1247_s12 = smov 16   ;;  %vm706_vm0 = vcmask 64512  }
  0x3f   : > { %s473_s19 = scalar_lea.vmem %s1573_s0, %s1028_s25  ;;  %v1451_v20 = vsub.s32 1, %v523_v18  ;;  %v1453_v21 = vsub.s32 0, %v523_v18  ;;  %vm511_vm2 = vcmp.lt.s32.totalorder %v1457_v26, 1  ;;  %vm518_vm3 = vcmp.lt.s32.totalorder %v1457_v26, 127  ;;  %s1248_s25 = smov 112  }
  0x40   : > { %1109 = vset.pattern.permute.xlu1 %v1238_v3  ;;  %1107 = vset.pattern.permute.xlu0 %v1239_v4  ;;  %v1438_v7 = vld [vmem:[%s473_s19] sm:$0xff]  ;;  %v1442_v8 = vld [vmem:[%s473_s19 + $0x8] sm:$0xff]  ;;  %vm626_vm10 = vcmp.lt.s32.totalorder %v1457_v26, 112  ;;  %vm619_vm11 = vcmp.lt.s32.totalorder %v1457_v26, 16  ;;  %s1524_s30 = scalar_lea.hbm %s1583_s10, %s1029_s24  ;;  %s831_s16 = scalar_lea.sflag [#allocation5], %s1417_s11 }
  0x41   : > { %594 = vperm.xlu1 %1109, %v547_v2   ;;  %556 = vperm.xlu0 %1107, %v547_v2   ;;  %v542_v27 = vrot.slane %v534_v23, %v1451_v20  ;;  %v525_v28 = vrot.slane %v521_v24, %v1453_v21  ;;  %v529_v29 = vrot.slane %v521_v24, %v1451_v20  ;;  %v816_v26 = vld [vmem:[%s1581_s8] sm:$0xff]  ;;  %p1596_p11 = scmp.ne.s32.totalorder %s1591_s26, 0  ;;  %s1250_s23 = smov [#allocation6]  }
  0x42   : > { %v538_v30 = vrot.slane %v534_v23, %v1453_v21  ;;  %s1155_s19 = sshll.u32 %s1250_s23, 4  ;;  %s1156_s19 = int_to_ptr.vmem [resolvable:$false] %s1155_s19 }
  0x43   : > { %vm544_vm4 = vcmp.eq.s32.totalorder %v542_v27, 1  ;;  %vm530_vm5 = vcmp.eq.s32.totalorder %v525_v28, 1  ;;  %vm531_vm6 = vcmp.eq.s32.totalorder %v529_v29, 1 }
  0x44   : > { %vm543_vm7 = vcmp.eq.s32.totalorder %v538_v30, 1 }
  0x45   : > { %1110 = vset.pattern.permute.xlu1 %v1240_v5  ;;  %1111 = vset.pattern.permute.xlu0 %v1241_v6 }
  0x46   : > { %600 = vperm.xlu1 %1110, %v547_v2   ;;  %608 = vperm.xlu0 %1111, %v547_v2  }
  0x4a   : > { %505 = vrot.lane.b32.xlu1 %v1438_v7, %s1242_s17  ;;  %514 = vrot.lane.b32.xlu0 %v1438_v7, %s1243_s20 }
  0x4b   : > { %1112 = vset.pattern.permute.xlu0 %v1244_v9  ;;  %1113 = vset.pattern.permute.xlu1 %v1245_v10 }
  0x4e   : > { %507 = vrot.lane.b32.xlu1 %v1442_v8, %s1242_s17  ;;  %572 = vperm.xlu0 %1112, %v547_v2   ;;  %s1157_s17 = scalar_lea.vmem %s1156_s19, 512 }
  0x52   : > { %516 = vrot.lane.b32.xlu1 %v1442_v8, %s1243_s20  ;;  %1115 = vset.pattern.permute.xlu0 %v1237_v1 }
  0x56   : > { %578 = vperm.xlu1 %1113, %v547_v2  }
  0x5a   : > { %1114 = vset.pattern.permute.xlu1 %v1246_v11 }
  0x5b   : > { %586 = vperm.xlu1 %1114, %v547_v2  }
  0x5f   : > { %1116 = vset.pattern.permute.xlu1 %v1237_v1 }
  0xbb   : > { %v565_v12 = vpop.permute.xlu1 %564  ;;  %v551_v13 = vpop.permute.xlu0 %550 }
  0xc0   : > { %v595_v14 = vpop.permute.xlu1 %594  ;;  %v557_v17 = vpop.permute.xlu0 %556 }
  0xc1   : > { %v559_v42 = vmul.f32 %v557_v17, %v1438_v7  ;;  %v560_v43 = vmul.f32 %v557_v17, %v1442_v8 }
  0xc5   : > { %v601_v19 = vpop.permute.xlu1 %600  ;;  %v609_v25 = vpop.permute.xlu0 %608 }
  0xc6   : > { %v603_v60 = vmul.f32 %v601_v19, %v1438_v7  ;;  %v604_v61 = vmul.f32 %v601_v19, %v1442_v8 }
  0xc9   : > { %v506_v22 = vpop.permute.xlu1 %505  ;;  %v515_v32 = vpop.permute.xlu0 %514 }
  0xcd   : > { %v508_v31 = vpop.permute.xlu1 %507  ;;  %v573_v47 = vpop.permute.xlu0 %572 }
  0xce   : > { %v512_v34 = vsel %vm511_vm2, %v506_v22, %v508_v31  ;;  %v513_v35 = vsel %vm511_vm2, %v508_v31, %v506_v22 }
  0xd1   : > { %v517_v33 = vpop.permute.xlu1 %516 }
  0xd2   : > { %v519_v36 = vsel %vm518_vm3, %v515_v32, %v517_v33  ;;  %v520_v37 = vsel %vm518_vm3, %v517_v33, %v515_v32 }
  0xd3   : > { %v546_v38 = vsel %vm544_vm4, %v512_v34, %v520_v37  ;;  %v532_v39 = vsel %vm530_vm5, %v519_v36, %v513_v35  ;;  %v533_v40 = vsel %vm531_vm6, %v520_v37, %v512_v34  ;;  %v545_v41 = vsel %vm543_vm7, %v513_v35, %v519_v36 }
  0xd4   : > { %v553_v44 = vmul.f32 %v551_v13, %v532_v39  ;;  %v554_v45 = vmul.f32 %v551_v13, %v533_v40  ;;  %v568_v49 = vmul.f32 %v565_v12, %v546_v38  ;;  %v567_v51 = vmul.f32 %v565_v12, %v545_v41 }
  0xd5   : > { %v579_v46 = vpop.permute.xlu1 %578  ;;  %v597_v54 = vmul.f32 %v595_v14, %v532_v39  ;;  %v598_v55 = vmul.f32 %v595_v14, %v533_v40  ;;  %v575_v58 = vmul.f32 %v573_v47, %v532_v39  ;;  %v576_v59 = vmul.f32 %v573_v47, %v533_v40 }
  0xd6   : > { %v562_v48 = vadd.f32 %v560_v43, %v554_v45  ;;  %v561_v50 = vadd.f32 %v559_v42, %v553_v44  ;;  %v581_v52 = vmul.f32 %v579_v46, %v1438_v7  ;;  %v582_v53 = vmul.f32 %v579_v46, %v1442_v8  ;;  %v498_v8 = vld [vmem:[%s1575_s2] ss:$2 sm:$0x3] }
  0xd7   : > { %v606_v4 = vadd.f32 %v604_v61, %v598_v55  ;;  %v605_v5 = vadd.f32 %v603_v60, %v597_v54  ;;  %v612_v10 = vmul.f32 %v609_v25, %v546_v38  ;;  %v611_v11 = vmul.f32 %v609_v25, %v545_v41  ;;  %v687_v44 = vld [vmem:[%s1577_s4] sm:$0xff] }
  0xd8   : > { %v570_v56 = vadd.f32 %v568_v49, %v562_v48  ;;  %v569_v57 = vadd.f32 %v567_v51, %v561_v50  ;;  %v583_v63 = vadd.f32 %v581_v52, %v575_v58  ;;  %v584_v0 = vadd.f32 %v582_v53, %v576_v59  ;;  %v808_v45 = vld [vmem:[%s1580_s7] sm:$0xff] }
  0xd9   : > { %v614_v7 = vadd.f32 %v612_v10, %v606_v4  ;;  %v613_v12 = vadd.f32 %v611_v11, %v605_v5  ;;  %vm503_vm8 = vcmp.eq.s32.totalorder %v498_v8, 0  ;;  %vm504_vm9 = vcmp.eq.s32.totalorder %v498_v8, 15  ;;  %v695_v53 = vld [vmem:[%s1578_s5] sm:$0xff] }
  0xda   : > { %617 = vrot.lane.b32.xlu1 %v570_v56, %s1247_s12  ;;  %v587_v62 = vpop.permute.xlu1 %586  ;;  %615 = vrot.lane.b32.xlu0 %v569_v57, %s1247_s12  ;;  %v641_v13 = vsel %vm503_vm8, 1, %v1237_v1  ;;  %v656_v22 = vsel %vm504_vm9, 1, %v1237_v1  ;;  %v790_v54 = vld [vmem:[%s1582_s9] sm:$0xff]  ;;  %v1249_v55 = vmov 0.0  }
  0xdb   : > { %v589_v2 = vmul.f32 %v587_v62, %v545_v41  ;;  %v590_v3 = vmul.f32 %v587_v62, %v546_v38  ;;  %v645_v16 = vrot.slane %v641_v13, %v1453_v21  ;;  %v649_v17 = vrot.slane %v641_v13, %v1451_v20  ;;  %774 = vmatprep.mubr.f32.mxu0 %v1249_v55  ;;  %v705_v5 = vld [vmem:[%s1579_s6] sm:$0xff] }
  0xdc   : > { %v660_v25 = vrot.slane %v656_v22, %v1453_v21  ;;  %v664_v27 = vrot.slane %v656_v22, %v1451_v20 }
  0xdd   : > { %v591_v6 = vadd.f32 %v589_v2, %v583_v63  ;;  %v592_v9 = vadd.f32 %v590_v3, %v584_v0  ;;  %vm650_vm12 = vcmp.eq.s32.totalorder %v645_v16, 1  ;;  %vm651_vm13 = vcmp.eq.s32.totalorder %v649_v17, 1 }
  0xde   : > { %624 = vrot.lane.b32.xlu1 %v570_v56, %s1248_s25  ;;  %622 = vrot.lane.b32.xlu0 %v569_v57, %s1248_s25  ;;  %vm665_vm14 = vcmp.eq.s32.totalorder %v660_v25, 1  ;;  %vm666_vm15 = vcmp.eq.s32.totalorder %v664_v27, 1  ;;  %v824_v27 = vld [vmem:[%s1423_s21] sm:$0xff] }
  0xe2   : > { %631 = vrot.lane.b32.xlu1 %v614_v7, %s1247_s12  ;;  %629 = vrot.lane.b32.xlu0 %v613_v12, %s1247_s12  ;;  %s845_s12 = sshll.u32 %s464_s22, 4  ;;  %s1526_s12 = int_to_ptr.vmem [resolvable:$true] %s845_s12 }
  0xe3   : > { %p1158_p13 = scmp.lt.s32.totalorder %s1526_s12, %s1156_s19 }
  0xe6   : > { %637 = vrot.lane.b32.xlu1 %v614_v7, %s1248_s25  ;;  %635 = vrot.lane.b32.xlu0 %v613_v12, %s1248_s25 }
 0x14c   : > { %v618_v14 = vpop.permute.xlu1 %617  ;;  %v616_v15 = vpop.permute.xlu0 %615 }
 0x14d   : > { %v620_v28 = vsel %vm619_vm11, %v616_v15, %v618_v14  ;;  %v621_v1 = vsel %vm619_vm11, %v618_v14, %v616_v15 }
 0x150   : > { %v625_v18 = vpop.permute.xlu1 %624  ;;  %v623_v19 = vpop.permute.xlu0 %622 }
 0x151   : > { %v627_v23 = vsel %vm626_vm10, %v623_v19, %v625_v18  ;;  %v628_v24 = vsel %vm626_vm10, %v625_v18, %v623_v19 }
 0x152   : > { %v652_v31 = vsel %vm650_vm12, %v627_v23, %v621_v1  ;;  %v653_v32 = vsel %vm651_vm13, %v628_v24, %v620_v28  ;;  %v825_v28 = vld [vmem:[%s1423_s21 + $0x8] sm:$0xff]  ;;  %s1151_s21 = scalar_lea.vmem %s1526_s12, 256 }
 0x153   : > { %v654_v33 = vadd.f32 %v652_v31, %v591_v6  ;;  %v655_v34 = vadd.f32 %v653_v32, %v592_v9  ;;  %p1152_p8 = scmp.ne.s32.totalorder %s1526_s12, %s1151_s21  ;;  %p1159_p3 = scmp.lt.s32.totalorder %s1157_s17, %s1151_s21 }
 0x154   : > { %v632_v29 = vpop.permute.xlu1 %631  ;;  %v630_v30 = vpop.permute.xlu0 %629 }
 0x155   : > { %v633_v21 = vsel %vm619_vm11, %v630_v30, %v632_v29  ;;  %v634_v20 = vsel %vm619_vm11, %v632_v29, %v630_v30  ;;  %p1153_p0 = pnand %p1152_p8, %p1596_p11  ;;  %p1160_p6 = por %p1159_p3, %p1158_p13 }
 0x157   : > { %p1154_p7 = pneg %p1153_p0 }
 0x158   : > { %v638_v35 = vpop.permute.xlu1 %637  ;;  %v636_v36 = vpop.permute.xlu0 %635 }
 0x159   : > { %v639_v37 = vsel %vm626_vm10, %v636_v36, %v638_v35  ;;  %v640_v38 = vsel %vm626_vm10, %v638_v35, %v636_v36  ;;  %p1161_p4 = pnand %p1160_p6, %p1154_p7 }
 0x15a   : > { %v667_v39 = vsel %vm665_vm14, %v634_v20, %v639_v37  ;;  %v668_v40 = vsel %vm666_vm15, %v633_v21, %v640_v38 }
 0x15b   : > { %v669_v41 = vadd.f32 %v667_v39, %v654_v33  ;;  %v670_v42 = vadd.f32 %v668_v40, %v655_v34 }
 0x15d   : > { %v671_v43 = vadd.f32 %v670_v42, %v669_v41 }
 0x15f   : > { %672 = vadd.xlane.f32.xlu0 %v671_v43 }
 0x175   : > { %690 = vperm.xlu0 %1115, %v687_v44  }
 0x179   : > { %811 = vperm.xlu0 %1115, %v808_v45  }
 0x17d   : > { %819 = vperm.xlu0 %1115, %v816_v26  }
 0x1ec   : > { %v673_v46 = vpop.xlane.xlu0 %672 }
 0x1ed   : > { %v674_v47 = vmul.f32 0.00390625, %v673_v46 }
 0x1ef   : > { %v675_v48 = vsub.f32 %v669_v41, %v674_v47  ;;  %v676_v49 = vsub.f32 %v670_v42, %v674_v47 }
 0x1f1   : > { %v677_v50 = vmul.f32 %v675_v48, %v675_v48  ;;  %v678_v51 = vmul.f32 %v676_v49, %v676_v49 }
 0x1f3   : > { %v679_v52 = vadd.f32 %v678_v51, %v677_v50 }
 0x1f4   : > { %v691_v62 = vpop.permute.xlu0 %690 }
 0x1f5   : > { %680 = vadd.xlane.f32.xlu1 %v679_v52 }
 0x1f8   : > { %v812_v17 = vpop.permute.xlu0 %811 }
 0x1fc   : > { %v820_v25 = vpop.permute.xlu0 %819 }
 0x206   : > { %698 = vperm.xlu1 %1116, %v695_v53  }
 0x20a   : > { %793 = vperm.xlu1 %1116, %v790_v54  }
 0x282   : > { %v681_v56 = vpop.xlane.xlu1 %680 }
 0x283   : > { %v682_v57 = vmul.f32 0.00390625, %v681_v56 }
 0x285   : > { %v683_v58 = vadd.f32 1e-05, %v682_v57 }
 0x286   : > { %v699_v2 = vpop.permute.xlu1 %698 }
 0x287   : > { %1117 = vrsqrt.f32 %v683_v58 }
 0x28a   : > { %v794_v6 = vpop.permute.xlu1 %793 }
 0x291   : > { %v1118_v59 = vpop.eup %1117 }
 0x292   : > { %v685_v60 = vmul.f32 %v1118_v59, %v675_v48  ;;  %v686_v61 = vmul.f32 %v1118_v59, %v676_v49 }
 0x294   : > { %v693_v63 = vmul.f32 %v691_v62, %v685_v60  ;;  %v694_v0 = vmul.f32 %v691_v62, %v686_v61 }
 0x296   : > { %v702_v3 = vadd.f32 %v699_v2, %v694_v0  ;;  %v701_v4 = vadd.f32 %v699_v2, %v693_v63 }
 0x298   : > { %710 = vmatprep.subr.mxu0 %v702_v3 }
 0x299   : > { %711 = vmatpush1.msra.mxu0 %v701_v4 }
 0x29a   : > { %1021 = vmatmul.mubr.msk.f32.vlgmr.msra.gmra.mrb[0].mxu0 %vm706_vm0, %v705_v5 }
 0x36d   : > { %v776_v9 = vpop.f32.mrb[0].mxu0 }
 0x36e   : > { %v796_v10 = vsub.f32 %v776_v9, %v794_v6  ;;  %v778_v11 = vpop.f32.mrb[1].mxu0 }
 0x36f   : > { %v797_v7 = vsub.f32 %v778_v11, %v794_v6 }
 0x370   : > { %v798_v12 = vmul.f32 %v796_v10, %v796_v10 }
 0x371   : > { %v799_v8 = vmul.f32 %v797_v7, %v797_v7 }
 0x373   : > { %v800_v13 = vadd.f32 %v799_v8, %v798_v12 }
 0x375   : > { %801 = vadd.xlane.f32.xlu1 %v800_v13 }
 0x402   : > { %v802_v14 = vpop.xlane.xlu1 %801 }
 0x403   : > { %v803_v15 = vmul.f32 0.00390625, %v802_v14 }
 0x405   : > { %v804_v16 = vadd.f32 1e-05, %v803_v15 }
 0x407   : > { %1119 = vrsqrt.f32 %v804_v16 }
 0x411   : > { %v1120_v18 = vpop.eup %1119 }
 0x412   : > { %v806_v19 = vmul.f32 %v1120_v18, %v796_v10  ;;  %v807_v22 = vmul.f32 %v1120_v18, %v797_v7 }
 0x414   : > { %v814_v23 = vmul.f32 %v812_v17, %v806_v19  ;;  %v815_v24 = vmul.f32 %v812_v17, %v807_v22 }
 0x416   : > { %v822_v1 = vadd.f32 %v820_v25, %v814_v23  ;;  %v823_v29 = vadd.f32 %v820_v25, %v815_v24 }
 0x418   : > { %v826_v30 = vadd.f32 %v824_v27, %v822_v1  ;;  %v827_v31 = vadd.f32 %v825_v28, %v823_v29 }
 0x41a   : > { %828 = vst [vmem:[%s464_s22] sm:$0xff] %v826_v30  ;;  %829 = vst [vmem:[%s464_s22 + $0x8] sm:$0xff] %v827_v31 }
 0x41b   : > { %1164 = shalt.err (!%p1161_p4)
}
 0x41c   : > { %s1165_s11 = scalar_lea.hbm %s1524_s30, 256  ;;  %s1169_s22 = scalar_lea.hbm %s1583_s10, 512 }
 0x41d   : > { %p1166_p10 = scmp.ne.s32.totalorder %s1524_s30, %s1165_s11  ;;  %p1170_p2 = scmp.lt.u32.totalorder %s1524_s30, %s1583_s10 }
 0x41e   : > { %p1171_p5 = scmp.lt.u32.totalorder %s1169_s22, %s1165_s11  ;;  %p1173_p8 = scmp.lt.u32.totalorder %s1165_s11, %s1524_s30 }
 0x41f   : > { %p1167_p12 = pnand %p1166_p10, %p1596_p11 }
 0x420   : > { %p1172_p9 = por %p1171_p5, %p1170_p2 }
 0x421   : > { %p1168_p1 = pneg %p1167_p12 }
 0x422   : > { %p1174_p0 = por %p1173_p8, %p1172_p9 }
 0x424   : > { %p1175_p7 = pnand %p1174_p0, %p1168_p1 }
 0x426   : > { %1178 = shalt.err (!%p1175_p7)
}
 0x427   : > { %1032 = dma.vmem_to_hbm [thread:$0]  (%p1596_p11), %s1526_s12, 256, %s1524_s30, %s831_s16  }
 0x428 PF: > { %s857_s21 = sand.u32 1, %s1213_s13   ;;  %p1597_p13 = scmp.ne.s32.totalorder %s1592_s28, 0 }
 0x429   : > { %p1598_p3 = scmp.ge.s32.totalorder %s1233_s18, 2  ;;  %s858_s23 = scalar_lea.sflag [#allocation5], %s857_s21 }
 0x42b   : > { %p1039_p6 = pnand %p1598_p3, %p1597_p13 }
 0x42d   : > { %1208 = dma.done.wait (!%p1039_p6), %s858_s23, 256  }
 0x42e   : > { %1210 = vsyncadd (!%p1039_p6), %s858_s23, 4294967040  ;;  %s26_s18 = sadd.s32 1, %s1233_s18   ;;  %s1599_s16 = sld [smem:[#allocation9_spill]] }
 0x42f   : > { %p23_p4 = scmp.ge.s32.totalorder %s26_s18, 4   ;;  %s1600_s17 = sld [smem:[#allocation10_spill]] }
 0x430   : > { %s1601_s13 = smov %s1217_s14  ;;  %s1602_s14 = smov %s1221_s15 }
 0x431   : > { %s1603_s15 = smov %s1362_s27  ;;  %25 = sbr.rel (!%p23_p4) target bundleno = 6 (0x6), region = 129 }
 0x438   :  { %863 = vsyncpa [#allocation4], 1 }
 0x439   :  { %865 = vsyncpa [#allocation4 + $0x1], 1 }
 0x43a   :  { %866 = vsyncpa [#allocation5], 1 }
 0x43b   :  { %868 = vsyncpa [#allocation5 + $0x1], 1 }

</bundles_post_ra>
